<compile_context>
chip_gen: v7x
topology: tpu7x:2x2x1
jax: 0.10.0
libtpu: 0.0.40
codegen_flags: <defaults>
</compile_context>

<pallas_src>
import jax
import jax.numpy as jnp
from jax.experimental import pallas as pl
from jax.experimental.pallas import tpu as pltpu

# Small deterministic hyperparameters consistent with Generator(latent_dim, seq_len, vocab_size)
LATENT_DIM = 16
SEQ_LEN = 8
VOCAB_SIZE = 4
BATCH = 2
HIDDEN = 100          # fixed by the module: fc -> 100*seq_len, conv stack starts at 100 channels
C1 = 32
C2 = 8
BN_EPS = 1e-5

N_ROWS = SEQ_LEN * BATCH       # activation rows, order (batch, length): r = b*SEQ_LEN + l
LANES = 128                    # lane-dense output width / slab width
NEG_PAD = -1e30                # softmax pad-lane bias (exp underflows to exactly 0)

# ---- row map of the single packed (SLAB_ROWS, 128) parameter slab (row starts 8-aligned) ----
WFC_ROW0 = 0                               # [  0,128): fc weight (S*K, 100), lanes [0,100)
BFC_ROW0 = WFC_ROW0 + SEQ_LEN * LATENT_DIM  # [128,144): fc bias rows (N, 100), r = b*S + l
MASK_ROW0 = BFC_ROW0 + N_ROWS              # [144,160): 0/1 block-diagonal fc mask (N, 128)
W1_ROW0 = MASK_ROW0 + N_ROWS               # [160,260): conv1 weight (100, 96) = [tap0|tap1|tap2]
W2_ROW0 = 264                              # [264,360): fused conv2 weight (3*C1, C2)
W3_ROW0 = W2_ROW0 + 3 * C1                 # [360,384): fused conv3 weight (3*C2, 128), lanes[:V]
VEC_ROW0 = W3_ROW0 + 3 * C2                # [384,391): b1, g1, bt1, b2, g2, bt2, b3(pad=-1e30)
SLAB_ROWS = 392


def generator_kernel(z_ref, sp_ref, out_ref):
    # ---------------- fc as ONE MXU matmul -------------------------------------------------
    # Row r = b*S + l carries z[b] in lane block [l*K, (l+1)*K) and zeros elsewhere, so
    # z_exp @ W_exp reproduces fc(z).view(B, 100, S) directly in channels-last,
    # (batch, length)-row layout.  The block-diagonal selection is a precomputed mask (slab).
    z_rep = jnp.concatenate(
        [jnp.broadcast_to(z_ref[b:b + 1, :], (SEQ_LEN, LATENT_DIM)) for b in range(BATCH)],
        axis=0)                                                     # (N, K)
    z_wide = jnp.concatenate([z_rep] * SEQ_LEN, axis=1)             # (N, S*K) = (16, 128)
    z_exp = z_wide * sp_ref[MASK_ROW0:MASK_ROW0 + N_ROWS, :]

    x = (jnp.dot(z_exp, sp_ref[WFC_ROW0:WFC_ROW0 + SEQ_LEN * LATENT_DIM, 0:HIDDEN],
                 preferred_element_type=jnp.float32)
         + sp_ref[BFC_ROW0:BFC_ROW0 + N_ROWS, 0:HIDDEN])            # (N, 100)

    # sequence-boundary masks (length position of row r is r % SEQ_LEN)
    row = jax.lax.broadcasted_iota(jnp.int32, (N_ROWS, 1), 0)
    lpos = row % SEQ_LEN
    keep_prev = (lpos != 0).astype(jnp.float32)                     # valid when l > 0
    keep_next = (lpos != SEQ_LEN - 1).astype(jnp.float32)           # valid when l < S-1

    def shifts(h):
        # Conv1d zero-padding: neighbours along the length axis, zeroed at the boundaries.
        hm = pltpu.roll(h, shift=1, axis=0) * keep_prev             # input at l-1
        hp = pltpu.roll(h, shift=N_ROWS - 1, axis=0) * keep_next    # input at l+1
        return hm, hp

    inv_n = 1.0 / N_ROWS

    def bn_relu(h, g, bt):
        # BatchNorm1d (training): biased batch stats over all (batch, length) rows.
        # sum(h) and sum(h*h) are independent reductions -> they overlap on the XLU.
        s1 = jnp.sum(h, axis=0, keepdims=True)
        s2 = jnp.sum(h * h, axis=0, keepdims=True)
        m = s1 * inv_n
        v = s2 * inv_n - m * m
        return jnp.maximum((h - m) * jax.lax.rsqrt(v + BN_EPS) * g + bt, 0.0)

    # ---------------- conv1: 100 -> 32 (split taps against the lane-packed (100, 96) weight) -
    xm, xp = shifts(x)
    h1 = (jnp.dot(xm, sp_ref[W1_ROW0:W1_ROW0 + HIDDEN, 0:C1],
                  preferred_element_type=jnp.float32)
          + jnp.dot(x, sp_ref[W1_ROW0:W1_ROW0 + HIDDEN, C1:2 * C1],
                    preferred_element_type=jnp.float32)
          + jnp.dot(xp, sp_ref[W1_ROW0:W1_ROW0 + HIDDEN, 2 * C1:3 * C1],
                    preferred_element_type=jnp.float32)
          + sp_ref[VEC_ROW0 + 0:VEC_ROW0 + 1, 0:C1])
    h1 = bn_relu(h1,
                 sp_ref[VEC_ROW0 + 1:VEC_ROW0 + 2, 0:C1],
                 sp_ref[VEC_ROW0 + 2:VEC_ROW0 + 3, 0:C1])

    # ---------------- conv2: 32 -> 8, taps fused into one (16, 96) @ (96, 8) matmul ----------
    h1m, h1p = shifts(h1)
    h1cat = jnp.concatenate([h1m, h1, h1p], axis=-1)                # (N, 96)
    h2 = (jnp.dot(h1cat, sp_ref[W2_ROW0:W2_ROW0 + 3 * C1, 0:C2],
                  preferred_element_type=jnp.float32)
          + sp_ref[VEC_ROW0 + 3:VEC_ROW0 + 4, 0:C2])
    h2 = bn_relu(h2,
                 sp_ref[VEC_ROW0 + 4:VEC_ROW0 + 5, 0:C2],
                 sp_ref[VEC_ROW0 + 5:VEC_ROW0 + 6, 0:C2])

    # ---------------- conv3: 8 -> vocab, fused taps, lane-padded to 128 for a dense store ----
    h2m, h2p = shifts(h2)
    h2cat = jnp.concatenate([h2m, h2, h2p], axis=-1)                # (N, 24)
    logits = (jnp.dot(h2cat, sp_ref[W3_ROW0:W3_ROW0 + 3 * C2, :],
                      preferred_element_type=jnp.float32)
              + sp_ref[VEC_ROW0 + 6:VEC_ROW0 + 7, :])               # pad lanes ~= -1e30

    # Softmax over the channel dim (PyTorch dim=1) == lane axis; pad lanes exp to exactly 0.
    mx = jnp.max(logits, axis=-1, keepdims=True)
    e = jnp.exp(logits - mx)
    s = jnp.sum(e, axis=-1, keepdims=True)
    out_ref[...] = e * pl.reciprocal(s, approx=False)               # exact: sum-to-1 preserved


@jax.jit
def generator_forward(z, slab):
    out = pl.pallas_call(
        generator_kernel,
        out_shape=jax.ShapeDtypeStruct((N_ROWS, LANES), jnp.float32),
        in_specs=[pl.BlockSpec(memory_space=pltpu.MemorySpace.VMEM)] * 2,
        out_specs=pl.BlockSpec(memory_space=pltpu.MemorySpace.VMEM),
    )(z, slab)
    # (B*S, 128) -> valid vocab lanes -> (B, S, V) -> (B, V, S): PyTorch output layout
    return jnp.transpose(out[:, :VOCAB_SIZE].reshape(BATCH, SEQ_LEN, VOCAB_SIZE), (0, 2, 1))


def init_params(key):
    ks = jax.random.split(key, 8)

    def u(k, shape, fan_in):
        bound = 1.0 / (fan_in ** 0.5)
        return jax.random.uniform(k, shape, jnp.float32, -bound, bound)

    # fc (re-laid-out Linear(latent, 100*S)): wfc[l*K + k, c] ~ PyTorch fc.weight[c*S + l, k]
    wfc = u(ks[0], (SEQ_LEN * LATENT_DIM, HIDDEN), LATENT_DIM)
    bfc = u(ks[1], (SEQ_LEN, HIDDEN), LATENT_DIM)                 # bfc[l, c] ~ fc.bias[c*S + l]
    bfc_rows = jnp.tile(bfc, (BATCH, 1))                          # (S*B, 100), rows r = b*S + l

    # conv1 split-tap weights: w1[t, ci, co] ~ PyTorch conv1.weight[co, ci, t]
    w1 = u(ks[2], (3, HIDDEN, C1), HIDDEN * 3)
    b1 = u(ks[3], (C1,), HIDDEN * 3)
    # conv2 / conv3 fused-tap weights: rows ordered [tap0 | tap1 | tap2] x Cin
    w2 = u(ks[4], (3 * C1, C2), C1 * 3)
    b2 = u(ks[5], (C2,), C1 * 3)
    w3 = u(ks[6], (3 * C2, VOCAB_SIZE), C2 * 3)
    b3 = u(ks[7], (VOCAB_SIZE,), C2 * 3)
    # BatchNorm affine params at fresh-module defaults
    g1 = jnp.ones((C1,), jnp.float32)
    bt1 = jnp.zeros((C1,), jnp.float32)
    g2 = jnp.ones((C2,), jnp.float32)
    bt2 = jnp.zeros((C2,), jnp.float32)

    # block-diagonal fc mask: mask[r, j] = 1 iff the lane block j//K matches the row's l = r%S
    rr = jnp.arange(N_ROWS)[:, None] % SEQ_LEN
    jj = jnp.arange(SEQ_LEN * LATENT_DIM)[None, :] // LATENT_DIM
    mask = (rr == jj).astype(jnp.float32)                          # (16, 128)

    def vec_row(v, fill=0.0):
        return jnp.full((LANES,), fill, jnp.float32).at[: v.shape[0]].set(v)

    # Single lane-dense slab holding EVERYTHING static -> one DMA instead of four.
    slab = jnp.zeros((SLAB_ROWS, LANES), jnp.float32)
    slab = slab.at[WFC_ROW0:WFC_ROW0 + SEQ_LEN * LATENT_DIM, :HIDDEN].set(wfc)
    slab = slab.at[BFC_ROW0:BFC_ROW0 + N_ROWS, :HIDDEN].set(bfc_rows)
    slab = slab.at[MASK_ROW0:MASK_ROW0 + N_ROWS, :].set(mask)
    slab = slab.at[W1_ROW0:W1_ROW0 + HIDDEN, :3 * C1].set(
        jnp.concatenate([w1[0], w1[1], w1[2]], axis=1))            # lane-packed (100, 96)
    slab = slab.at[W2_ROW0:W2_ROW0 + 3 * C1, :C2].set(w2)
    slab = slab.at[W3_ROW0:W3_ROW0 + 3 * C2, :VOCAB_SIZE].set(w3)
    vrows = jnp.stack([vec_row(b1), vec_row(g1), vec_row(bt1),
                       vec_row(b2), vec_row(g2), vec_row(bt2),
                       vec_row(b3, fill=NEG_PAD)])
    slab = slab.at[VEC_ROW0:VEC_ROW0 + 7, :].set(vrows)
    return slab


def reference_forward(z, slab):
    """Plain-JAX re-implementation of the PyTorch Generator forward (NCL domain)."""
    hi = jax.lax.Precision.HIGHEST

    wfc = slab[WFC_ROW0:WFC_ROW0 + SEQ_LEN * LATENT_DIM, :HIDDEN]
    b_fc = slab[BFC_ROW0:BFC_ROW0 + SEQ_LEN, :HIDDEN]             # rows of batch 0 = [l, c]
    w1_lane = slab[W1_ROW0:W1_ROW0 + HIDDEN, :3 * C1]
    w1 = jnp.stack([w1_lane[:, 0:C1], w1_lane[:, C1:2 * C1], w1_lane[:, 2 * C1:3 * C1]])
    w2 = slab[W2_ROW0:W2_ROW0 + 3 * C1, :C2].reshape(3, C1, C2)
    w3 = slab[W3_ROW0:W3_ROW0 + 3 * C2, :VOCAB_SIZE].reshape(3, C2, VOCAB_SIZE)
    b1, g1, bt1 = (slab[VEC_ROW0 + i, :C1] for i in range(3))
    b2, g2, bt2 = (slab[VEC_ROW0 + 3 + i, :C2] for i in range(3))
    b3 = slab[VEC_ROW0 + 6, :VOCAB_SIZE]

    w_fc = wfc.reshape(SEQ_LEN, LATENT_DIM, HIDDEN)               # [l, k, c]
    x = jnp.einsum("bk,lkc->bcl", z, w_fc, precision=hi) + b_fc.T[None]   # (B, 100, S)

    def conv(xin, w_taps, b):                                     # w_taps: (3, Cin, Cout)
        xpad = jnp.pad(xin, ((0, 0), (0, 0), (1, 1)))
        y = (jnp.einsum("bil,io->bol", xpad[:, :, :-2], w_taps[0], precision=hi)
             + jnp.einsum("bil,io->bol", xpad[:, :, 1:-1], w_taps[1], precision=hi)
             + jnp.einsum("bil,io->bol", xpad[:, :, 2:], w_taps[2], precision=hi))
        return y + b[None, :, None]

    def bn_relu(h, g, bt):
        m = jnp.mean(h, axis=(0, 2), keepdims=True)
        v = jnp.mean((h - m) ** 2, axis=(0, 2), keepdims=True)
        y = (h - m) * jax.lax.rsqrt(v + BN_EPS) * g[None, :, None] + bt[None, :, None]
        return jnp.maximum(y, 0.0)

    h1 = bn_relu(conv(x, w1, b1), g1, bt1)
    h2 = bn_relu(conv(h1, w2, b2), g2, bt2)
    return jax.nn.softmax(conv(h2, w3, b3), axis=1)               # (B, vocab, S)


if __name__ == "__main__":
    key = jax.random.PRNGKey(0)
    pkey, zkey = jax.random.split(key)
    slab = init_params(pkey)
    z = jax.random.normal(zkey, (BATCH, LATENT_DIM), jnp.float32)

    out = jax.block_until_ready(generator_forward(z, slab))

    assert out.shape == (BATCH, VOCAB_SIZE, SEQ_LEN), out.shape
    assert bool(jnp.all(jnp.isfinite(out)))
    # softmax over the channel dim must sum to 1 for every (batch, length) position
    assert bool(jnp.allclose(jnp.sum(out, axis=1), 1.0, atol=1e-5))
    # cross-check against a plain-JAX reference of the same module (loose tol: MXU f32 passes)
    ref = reference_forward(z, slab)
    assert bool(jnp.allclose(out, ref, atol=1e-2)), float(jnp.max(jnp.abs(out - ref)))
    print("KERNEL_OK")
</pallas_src>

<mosaic_0001>
module attributes {stable_mosaic.version = 11 : i64} {
  func.func @generator_kernel(%arg0: memref<2x16xf32, #tpu.memory_space<vmem>>, %arg1: memref<392x128xf32, #tpu.memory_space<vmem>>, %arg2: memref<16x128xf32, #tpu.memory_space<vmem>>) attributes {dimension_semantics = [], scalar_prefetch = 0 : i64, scratch_operands = 0 : i64, tpu.core_type = #tpu.core_type<tc>} {
    %c0 = arith.constant 0 : index
    %c0_0 = arith.constant 0 : index
    %0 = vector.load %arg0[%c0, %c0_0] : memref<2x16xf32, #tpu.memory_space<vmem>>, vector<1x16xf32>
    %1 = vector.shape_cast %0 : vector<1x16xf32> to vector<1x16xf32>
    %2 = vector.broadcast %1 : vector<1x16xf32> to vector<8x16xf32>
    %c1 = arith.constant 1 : index
    %c0_1 = arith.constant 0 : index
    %3 = vector.load %arg0[%c1, %c0_1] : memref<2x16xf32, #tpu.memory_space<vmem>>, vector<1x16xf32>
    %4 = vector.shape_cast %3 : vector<1x16xf32> to vector<1x16xf32>
    %5 = vector.broadcast %4 : vector<1x16xf32> to vector<8x16xf32>
    %6 = tpu.concatenate %2, %5 in 0 : vector<8x16xf32>, vector<8x16xf32> -> vector<16x16xf32>
    %7 = tpu.concatenate %6, %6, %6, %6, %6, %6, %6, %6 in 1 : vector<16x16xf32>, vector<16x16xf32>, vector<16x16xf32>, vector<16x16xf32>, vector<16x16xf32>, vector<16x16xf32>, vector<16x16xf32>, vector<16x16xf32> -> vector<16x128xf32>
    %c144 = arith.constant 144 : index
    %c0_2 = arith.constant 0 : index
    %8 = vector.load %arg1[%c144, %c0_2] : memref<392x128xf32, #tpu.memory_space<vmem>>, vector<16x128xf32>
    %9 = arith.mulf %7, %8 : vector<16x128xf32>
    %c0_3 = arith.constant 0 : index
    %c0_4 = arith.constant 0 : index
    %10 = vector.load %arg1[%c0_3, %c0_4] : memref<392x128xf32, #tpu.memory_space<vmem>>, vector<128x100xf32>
    %cst = arith.constant dense<0.000000e+00> : vector<16x100xf32>
    %11 = tpu.matmul %9, %10, %cst {dimension_numbers = #tpu.dot_dimension_numbers<[1], [0], [0], [1], [0, 0, 1, 1], [], []>} : vector<16x128xf32>, vector<128x100xf32>, vector<16x100xf32> -> vector<16x100xf32>
    %c128 = arith.constant 128 : index
    %c0_5 = arith.constant 0 : index
    %12 = vector.load %arg1[%c128, %c0_5] : memref<392x128xf32, #tpu.memory_space<vmem>>, vector<16x100xf32>
    %13 = arith.addf %11, %12 : vector<16x100xf32>
    %14 = tpu.iota {dimensions = array<i32: 0>} : vector<16x1xi32>
    %c8_i32 = arith.constant 8 : i32
    %c0_i32 = arith.constant 0 : i32
    %15 = arith.cmpi eq, %c8_i32, %c0_i32 : i32
    %c1_i32 = arith.constant 1 : i32
    %16 = arith.select %15, %c1_i32, %c8_i32 : i32
    %17 = vector.broadcast %16 : i32 to vector<16x1xi32>
    %18 = arith.remsi %14, %17 : vector<16x1xi32>
    %c0_i32_6 = arith.constant 0 : i32
    %19 = vector.broadcast %c0_i32_6 : i32 to vector<16x1xi32>
    %20 = arith.cmpi ne, %18, %19 : vector<16x1xi32>
    %c0_i32_7 = arith.constant 0 : i32
    %21 = vector.broadcast %c0_i32_7 : i32 to vector<16x1xi32>
    %22 = arith.cmpi slt, %18, %21 : vector<16x1xi32>
    %c0_i32_8 = arith.constant 0 : i32
    %23 = arith.cmpi slt, %16, %c0_i32_8 : i32
    %24 = vector.broadcast %23 : i1 to vector<16x1xi1>
    %25 = vector.broadcast %24 : vector<16x1xi1> to vector<16x1xi1>
    %26 = arith.xori %22, %25 : vector<16x1xi1>
    %27 = arith.andi %26, %20 : vector<16x1xi1>
    %28 = vector.broadcast %16 : i32 to vector<16x1xi32>
    %29 = arith.addi %18, %28 : vector<16x1xi32>
    %30 = arith.select %27, %29, %18 : vector<16x1xi1>, vector<16x1xi32>
    %c0_i32_9 = arith.constant 0 : i32
    %31 = vector.broadcast %c0_i32_9 : i32 to vector<16x1xi32>
    %32 = arith.cmpi ne, %30, %31 : vector<16x1xi32>
    %33 = arith.extui %32 : vector<16x1xi1> to vector<16x1xi32>
    %34 = arith.sitofp %33 : vector<16x1xi32> to vector<16x1xf32>
    %c7_i32 = arith.constant 7 : i32
    %35 = vector.broadcast %c7_i32 : i32 to vector<16x1xi32>
    %36 = arith.cmpi ne, %30, %35 : vector<16x1xi32>
    %37 = arith.extui %36 : vector<16x1xi1> to vector<16x1xi32>
    %38 = arith.sitofp %37 : vector<16x1xi32> to vector<16x1xf32>
    %c1_i32_10 = arith.constant 1 : i32
    %39 = tpu.dynamic_rotate %13 by %c1_i32_10 dim 0 : vector<16x100xf32>, i32 -> vector<16x100xf32>
    %40 = vector.broadcast %34 : vector<16x1xf32> to vector<16x100xf32>
    %41 = arith.mulf %39, %40 : vector<16x100xf32>
    %c15_i32 = arith.constant 15 : i32
    %42 = tpu.dynamic_rotate %13 by %c15_i32 dim 0 : vector<16x100xf32>, i32 -> vector<16x100xf32>
    %43 = vector.broadcast %38 : vector<16x1xf32> to vector<16x100xf32>
    %44 = arith.mulf %42, %43 : vector<16x100xf32>
    %c160 = arith.constant 160 : index
    %c0_11 = arith.constant 0 : index
    %45 = vector.load %arg1[%c160, %c0_11] : memref<392x128xf32, #tpu.memory_space<vmem>>, vector<100x32xf32>
    %cst_12 = arith.constant dense<0.000000e+00> : vector<16x32xf32>
    %46 = tpu.matmul %41, %45, %cst_12 {dimension_numbers = #tpu.dot_dimension_numbers<[1], [0], [0], [1], [0, 0, 1, 1], [], []>} : vector<16x100xf32>, vector<100x32xf32>, vector<16x32xf32> -> vector<16x32xf32>
    %c160_13 = arith.constant 160 : index
    %c32 = arith.constant 32 : index
    %47 = vector.load %arg1[%c160_13, %c32] : memref<392x128xf32, #tpu.memory_space<vmem>>, vector<100x32xf32>
    %cst_14 = arith.constant dense<0.000000e+00> : vector<16x32xf32>
    %48 = tpu.matmul %13, %47, %cst_14 {dimension_numbers = #tpu.dot_dimension_numbers<[1], [0], [0], [1], [0, 0, 1, 1], [], []>} : vector<16x100xf32>, vector<100x32xf32>, vector<16x32xf32> -> vector<16x32xf32>
    %49 = arith.addf %46, %48 : vector<16x32xf32>
    %c160_15 = arith.constant 160 : index
    %c64 = arith.constant 64 : index
    %50 = vector.load %arg1[%c160_15, %c64] : memref<392x128xf32, #tpu.memory_space<vmem>>, vector<100x32xf32>
    %cst_16 = arith.constant dense<0.000000e+00> : vector<16x32xf32>
    %51 = tpu.matmul %44, %50, %cst_16 {dimension_numbers = #tpu.dot_dimension_numbers<[1], [0], [0], [1], [0, 0, 1, 1], [], []>} : vector<16x100xf32>, vector<100x32xf32>, vector<16x32xf32> -> vector<16x32xf32>
    %52 = arith.addf %49, %51 : vector<16x32xf32>
    %c384 = arith.constant 384 : index
    %c0_17 = arith.constant 0 : index
    %53 = vector.load %arg1[%c384, %c0_17] : memref<392x128xf32, #tpu.memory_space<vmem>>, vector<1x32xf32>
    %54 = vector.broadcast %53 : vector<1x32xf32> to vector<16x32xf32>
    %55 = arith.addf %52, %54 : vector<16x32xf32>
    %c385 = arith.constant 385 : index
    %c0_18 = arith.constant 0 : index
    %56 = vector.load %arg1[%c385, %c0_18] : memref<392x128xf32, #tpu.memory_space<vmem>>, vector<1x32xf32>
    %c386 = arith.constant 386 : index
    %c0_19 = arith.constant 0 : index
    %57 = vector.load %arg1[%c386, %c0_19] : memref<392x128xf32, #tpu.memory_space<vmem>>, vector<1x32xf32>
    %cst_20 = arith.constant dense<0.000000e+00> : vector<32xf32>
    %58 = vector.multi_reduction <add>, %55, %cst_20 [0] : vector<16x32xf32> to vector<32xf32>
    %59 = vector.shape_cast %58 : vector<32xf32> to vector<1x32xf32>
    %60 = arith.mulf %55, %55 : vector<16x32xf32>
    %cst_21 = arith.constant dense<0.000000e+00> : vector<32xf32>
    %61 = vector.multi_reduction <add>, %60, %cst_21 [0] : vector<16x32xf32> to vector<32xf32>
    %62 = vector.shape_cast %61 : vector<32xf32> to vector<1x32xf32>
    %cst_22 = arith.constant 6.250000e-02 : f32
    %63 = vector.broadcast %cst_22 : f32 to vector<1x32xf32>
    %64 = arith.mulf %59, %63 : vector<1x32xf32>
    %cst_23 = arith.constant 6.250000e-02 : f32
    %65 = vector.broadcast %cst_23 : f32 to vector<1x32xf32>
    %66 = arith.mulf %62, %65 : vector<1x32xf32>
    %67 = arith.mulf %64, %64 : vector<1x32xf32>
    %68 = arith.subf %66, %67 : vector<1x32xf32>
    %69 = vector.broadcast %64 : vector<1x32xf32> to vector<16x32xf32>
    %70 = arith.subf %55, %69 : vector<16x32xf32>
    %cst_24 = arith.constant 9.99999974E-6 : f32
    %71 = vector.broadcast %cst_24 : f32 to vector<1x32xf32>
    %72 = arith.addf %68, %71 : vector<1x32xf32>
    %73 = math.rsqrt %72 : vector<1x32xf32>
    %74 = vector.broadcast %73 : vector<1x32xf32> to vector<16x32xf32>
    %75 = arith.mulf %70, %74 : vector<16x32xf32>
    %76 = vector.broadcast %56 : vector<1x32xf32> to vector<16x32xf32>
    %77 = arith.mulf %75, %76 : vector<16x32xf32>
    %78 = vector.broadcast %57 : vector<1x32xf32> to vector<16x32xf32>
    %79 = arith.addf %77, %78 : vector<16x32xf32>
    %cst_25 = arith.constant 0.000000e+00 : f32
    %80 = vector.broadcast %cst_25 : f32 to vector<16x32xf32>
    %81 = arith.maximumf %79, %80 : vector<16x32xf32>
    %c1_i32_26 = arith.constant 1 : i32
    %82 = tpu.dynamic_rotate %81 by %c1_i32_26 dim 0 : vector<16x32xf32>, i32 -> vector<16x32xf32>
    %83 = vector.broadcast %34 : vector<16x1xf32> to vector<16x32xf32>
    %84 = arith.mulf %82, %83 : vector<16x32xf32>
    %c15_i32_27 = arith.constant 15 : i32
    %85 = tpu.dynamic_rotate %81 by %c15_i32_27 dim 0 : vector<16x32xf32>, i32 -> vector<16x32xf32>
    %86 = vector.broadcast %38 : vector<16x1xf32> to vector<16x32xf32>
    %87 = arith.mulf %85, %86 : vector<16x32xf32>
    %88 = tpu.concatenate %84, %81, %87 in 1 : vector<16x32xf32>, vector<16x32xf32>, vector<16x32xf32> -> vector<16x96xf32>
    %c264 = arith.constant 264 : index
    %c0_28 = arith.constant 0 : index
    %89 = vector.load %arg1[%c264, %c0_28] : memref<392x128xf32, #tpu.memory_space<vmem>>, vector<96x8xf32>
    %cst_29 = arith.constant dense<0.000000e+00> : vector<16x8xf32>
    %90 = tpu.matmul %88, %89, %cst_29 {dimension_numbers = #tpu.dot_dimension_numbers<[1], [0], [0], [1], [0, 0, 1, 1], [], []>} : vector<16x96xf32>, vector<96x8xf32>, vector<16x8xf32> -> vector<16x8xf32>
    %c387 = arith.constant 387 : index
    %c0_30 = arith.constant 0 : index
    %91 = vector.load %arg1[%c387, %c0_30] : memref<392x128xf32, #tpu.memory_space<vmem>>, vector<1x8xf32>
    %92 = vector.broadcast %91 : vector<1x8xf32> to vector<16x8xf32>
    %93 = arith.addf %90, %92 : vector<16x8xf32>
    %c388 = arith.constant 388 : index
    %c0_31 = arith.constant 0 : index
    %94 = vector.load %arg1[%c388, %c0_31] : memref<392x128xf32, #tpu.memory_space<vmem>>, vector<1x8xf32>
    %c389 = arith.constant 389 : index
    %c0_32 = arith.constant 0 : index
    %95 = vector.load %arg1[%c389, %c0_32] : memref<392x128xf32, #tpu.memory_space<vmem>>, vector<1x8xf32>
    %cst_33 = arith.constant dense<0.000000e+00> : vector<8xf32>
    %96 = vector.multi_reduction <add>, %93, %cst_33 [0] : vector<16x8xf32> to vector<8xf32>
    %97 = vector.shape_cast %96 : vector<8xf32> to vector<1x8xf32>
    %98 = arith.mulf %93, %93 : vector<16x8xf32>
    %cst_34 = arith.constant dense<0.000000e+00> : vector<8xf32>
    %99 = vector.multi_reduction <add>, %98, %cst_34 [0] : vector<16x8xf32> to vector<8xf32>
    %100 = vector.shape_cast %99 : vector<8xf32> to vector<1x8xf32>
    %cst_35 = arith.constant 6.250000e-02 : f32
    %101 = vector.broadcast %cst_35 : f32 to vector<1x8xf32>
    %102 = arith.mulf %97, %101 : vector<1x8xf32>
    %cst_36 = arith.constant 6.250000e-02 : f32
    %103 = vector.broadcast %cst_36 : f32 to vector<1x8xf32>
    %104 = arith.mulf %100, %103 : vector<1x8xf32>
    %105 = arith.mulf %102, %102 : vector<1x8xf32>
    %106 = arith.subf %104, %105 : vector<1x8xf32>
    %107 = vector.broadcast %102 : vector<1x8xf32> to vector<16x8xf32>
    %108 = arith.subf %93, %107 : vector<16x8xf32>
    %cst_37 = arith.constant 9.99999974E-6 : f32
    %109 = vector.broadcast %cst_37 : f32 to vector<1x8xf32>
    %110 = arith.addf %106, %109 : vector<1x8xf32>
    %111 = math.rsqrt %110 : vector<1x8xf32>
    %112 = vector.broadcast %111 : vector<1x8xf32> to vector<16x8xf32>
    %113 = arith.mulf %108, %112 : vector<16x8xf32>
    %114 = vector.broadcast %94 : vector<1x8xf32> to vector<16x8xf32>
    %115 = arith.mulf %113, %114 : vector<16x8xf32>
    %116 = vector.broadcast %95 : vector<1x8xf32> to vector<16x8xf32>
    %117 = arith.addf %115, %116 : vector<16x8xf32>
    %cst_38 = arith.constant 0.000000e+00 : f32
    %118 = vector.broadcast %cst_38 : f32 to vector<16x8xf32>
    %119 = arith.maximumf %117, %118 : vector<16x8xf32>
    %c1_i32_39 = arith.constant 1 : i32
    %120 = tpu.dynamic_rotate %119 by %c1_i32_39 dim 0 : vector<16x8xf32>, i32 -> vector<16x8xf32>
    %121 = vector.broadcast %34 : vector<16x1xf32> to vector<16x8xf32>
    %122 = arith.mulf %120, %121 : vector<16x8xf32>
    %c15_i32_40 = arith.constant 15 : i32
    %123 = tpu.dynamic_rotate %119 by %c15_i32_40 dim 0 : vector<16x8xf32>, i32 -> vector<16x8xf32>
    %124 = vector.broadcast %38 : vector<16x1xf32> to vector<16x8xf32>
    %125 = arith.mulf %123, %124 : vector<16x8xf32>
    %126 = tpu.concatenate %122, %119, %125 in 1 : vector<16x8xf32>, vector<16x8xf32>, vector<16x8xf32> -> vector<16x24xf32>
    %c360 = arith.constant 360 : index
    %c0_41 = arith.constant 0 : index
    %127 = vector.load %arg1[%c360, %c0_41] : memref<392x128xf32, #tpu.memory_space<vmem>>, vector<24x128xf32>
    %cst_42 = arith.constant dense<0.000000e+00> : vector<16x128xf32>
    %128 = tpu.matmul %126, %127, %cst_42 {dimension_numbers = #tpu.dot_dimension_numbers<[1], [0], [0], [1], [0, 0, 1, 1], [], []>} : vector<16x24xf32>, vector<24x128xf32>, vector<16x128xf32> -> vector<16x128xf32>
    %c390 = arith.constant 390 : index
    %c0_43 = arith.constant 0 : index
    %129 = vector.load %arg1[%c390, %c0_43] : memref<392x128xf32, #tpu.memory_space<vmem>>, vector<1x128xf32>
    %130 = vector.broadcast %129 : vector<1x128xf32> to vector<16x128xf32>
    %131 = arith.addf %128, %130 : vector<16x128xf32>
    %cst_44 = arith.constant dense<0xFF800000> : vector<16xf32>
    %132 = vector.multi_reduction <maximumf>, %131, %cst_44 [1] : vector<16x128xf32> to vector<16xf32>
    %133 = vector.shape_cast %132 : vector<16xf32> to vector<16x1xf32>
    %134 = vector.broadcast %133 : vector<16x1xf32> to vector<16x128xf32>
    %135 = arith.subf %131, %134 : vector<16x128xf32>
    %136 = math.exp %135 : vector<16x128xf32>
    %cst_45 = arith.constant dense<0.000000e+00> : vector<16xf32>
    %137 = vector.multi_reduction <add>, %136, %cst_45 [1] : vector<16x128xf32> to vector<16xf32>
    %138 = vector.shape_cast %137 : vector<16xf32> to vector<16x1xf32>
    %139 = tpu.reciprocal %138 : vector<16x1xf32> -> vector<16x1xf32>
    %140 = vector.broadcast %139 : vector<16x1xf32> to vector<16x128xf32>
    %141 = arith.mulf %136, %140 : vector<16x128xf32>
    %c0_46 = arith.constant 0 : index
    %c0_47 = arith.constant 0 : index
    %142 = vector.load %arg2[%c0_46, %c0_47] : memref<16x128xf32, #tpu.memory_space<vmem>>, vector<16x128xf32>
    tpu.vector_store %arg2[%c0_46, %c0_47], %141 {strides = array<i32>} : memref<16x128xf32, #tpu.memory_space<vmem>>, vector<16x128xf32>,
    return
  }
}

</mosaic_0001>

<bundles_post_ra>
// kernel: generator_forward.1
= control target key start
LH: loop header
LB: loop body
LE: loop exit
PB: predicated region body
PF: predicated region fallthrough
CT: control target
= control target key end

     0   :  { %7 = vsyncpa [#allocation3], 0  ;;  %s1793_s0 = inlined_call_operand.hbm [shape: f32[2,16], index: 0, kind: input, shape index: {}]   ;;  %s1794_s1 = inlined_call_operand.hbm [shape: f32[392,128], index: 1, kind: input, shape index: {}]   ;;  %s1795_s2 = inlined_call_operand.vmem [shape: f32[16,128], index: 2, kind: output, shape index: {}]  }
   0x1   :  { %8 = vsyncpa [#allocation5], 0  ;;  %s1529_s9 = smov [#allocation2]   ;;  %s1530_s11 = smov [#allocation4]  }
   0x2   :  { %s15_s10 = sshll.u32 %s1529_s9, 4  ;;  %s24_s12 = sshll.u32 %s1530_s11, 4  ;;  %s16_s10 = int_to_ptr.vmem [resolvable:$true] %s15_s10  ;;  %s1556_s12 = int_to_ptr.vmem [resolvable:$true] %s24_s12 }
   0x3   :  { %s1481_s15 = scalar_lea.hbm %s1793_s0, 32 }
   0x4   :  { %p1482_p0 = scmp.ne.s32.totalorder %s1793_s0, %s1481_s15  ;;  %p1485_p1 = scmp.lt.u32.totalorder %s1481_s15, %s1793_s0 }
   0x6   :  { %p1487_p2 = pnand %p1485_p1, %p1482_p0 }
   0x8   :  { %1490 = shalt.err (!%p1487_p2)
}
   0x9   :  { %s1491_s20 = scalar_lea.vmem %s16_s10, 32  ;;  %p1496_p4 = scmp.lt.s32.totalorder %s16_s10, %s16_s10 }
   0xa   :  { %p1492_p3 = scmp.ne.s32.totalorder %s16_s10, %s1491_s20  ;;  %p1497_p5 = scmp.lt.s32.totalorder %s1491_s20, %s1491_s20 }
   0xc   :  { %p1498_p6 = por %p1497_p5, %p1496_p4 }
   0xe   :  { %p1499_p7 = pnand %p1498_p6, %p1492_p3 }
  0x10   :  { %1502 = shalt.err (!%p1499_p7)
}
  0x11   :  { %18 = dma.hbm_to_vmem [thread:$0]  %s1793_s0, 32, %s16_s10, [#allocation3]  }
  0x12   :  { %s1503_s25 = scalar_lea.hbm %s1794_s1, 6272 }
  0x13   :  { %p1504_p8 = scmp.ne.s32.totalorder %s1794_s1, %s1503_s25  ;;  %p1507_p9 = scmp.lt.u32.totalorder %s1503_s25, %s1794_s1 }
  0x15   :  { %p1509_p10 = pnand %p1507_p9, %p1504_p8 }
  0x17   :  { %1512 = shalt.err (!%p1509_p10)
}
  0x18   :  { %s1513_s30 = scalar_lea.vmem %s1556_s12, 6272  ;;  %p1518_p12 = scmp.lt.s32.totalorder %s1556_s12, %s1556_s12 }
  0x19   :  { %p1514_p11 = scmp.ne.s32.totalorder %s1556_s12, %s1513_s30  ;;  %p1519_p13 = scmp.lt.s32.totalorder %s1513_s30, %s1513_s30 }
  0x1b   :  { %p1520_p0 = por %p1519_p13, %p1518_p12 }
  0x1d   :  { %p1521_p1 = pnand %p1520_p0, %p1514_p11 }
  0x1f   :  { %1524 = shalt.err (!%p1521_p1)
}
  0x20   :  { %s1531_s0 = smov 128   ;;  %s1532_s3 = smov 8  }
  0x21   :  { %30 = dma.hbm_to_vmem [thread:$0]  %s1794_s1, 6272, %s1556_s12, [#allocation5], %s1531_s0, %s1531_s0, %s1532_s3  }
  0x22   :  { %1525 = dma.done.wait [#allocation3], 32  }
  0x23   :  { %1526 = vsyncadd [#allocation3], 4294967264 }
  0x24   :  { %1527 = dma.done.wait [#allocation5], 6272  }
  0x25   :  { %1528 = vsyncadd [#allocation5], 4294961024  ;;  %v1588_v0 = vld [vmem:[#allocation2] ss:$0 sm:$0xff]  ;;  %v116_v1 = vld [vmem:[#allocation4] sm:$0xff]  ;;  %s1533_s6 = smov 32  }
  0x26   :  { %55 = vrot.lane.b32.xlu1 %v1588_v0, %s1533_s6  ;;  %s1534_s7 = smov 16   ;;  %v117_v2 = vld [vmem:[#allocation4 + $0x8] sm:$0xff]  ;;  %v118_v3 = vld [vmem:[#allocation4 + $0x10] sm:$0xff]  ;;  %v119_v4 = vld [vmem:[#allocation4 + $0x18] sm:$0xff]  ;;  %s1535_s1 = smov 48   ;;  %vm91_vm0 = vcmask 130048  }
  0x27   :  { %49 = vrot.lane.b32.xlu0 %v1588_v0, %s1534_s7  ;;  %v1594_v5 = vld [vmem:[#allocation2 + $0x1] ss:$0 sm:$0xff]  ;;  %v1261_v6 = vpack.c.bf16 %v117_v2, %v116_v1  ;;  %v1265_v7 = vpack.c.bf16 %v119_v4, %v118_v3  ;;  %v120_v8 = vld [vmem:[#allocation4 + $0x20] sm:$0xff]  ;;  %v121_v9 = vld [vmem:[#allocation4 + $0x28] sm:$0xff]  ;;  %s1536_s8 = smov 64   ;;  %s1537_s9 = smov 80  }
  0x28   :  { %v1269_v10 = vpack.c.bf16 %v121_v9, %v120_v8  ;;  %v122_v11 = vld [vmem:[#allocation4 + $0x30] sm:$0xff]  ;;  %v123_v12 = vld [vmem:[#allocation4 + $0x38] sm:$0xff]  ;;  %v124_v14 = vld [vmem:[#allocation4 + $0x40] sm:$0xff]  ;;  %s1538_s10 = smov 96   ;;  %s1539_s11 = smov 112   ;;  %vm94_vm1 = vcmask 261120  }
  0x29   :  { %1262 = vmatprep.subr.bf16.mxu0 %v1261_v6  ;;  %v1273_v13 = vpack.c.bf16 %v123_v12, %v122_v11  ;;  %v125_v15 = vld [vmem:[#allocation4 + $0x48] sm:$0xff]  ;;  %v126_v17 = vld [vmem:[#allocation4 + $0x50] sm:$0xff]  ;;  %v127_v18 = vld [vmem:[#allocation4 + $0x58] sm:$0xff]  ;;  %vm97_vm2 = vcmask 392192   ;;  %vm100_vm3 = vcmask 523264   ;;  %vm103_vm4 = vcmask 654336  }
  0x2a   :  { %57 = vrot.lane.b32.xlu1 %v1594_v5, %s1533_s6  ;;  %1264 = vmatpush3.bf16.msra.mxu0 %v1261_v6  ;;  %v1277_v16 = vpack.c.bf16 %v125_v15, %v124_v14  ;;  %v1281_v19 = vpack.c.bf16 %v127_v18, %v126_v17  ;;  %v128_v20 = vld [vmem:[#allocation4 + $0x60] sm:$0xff]  ;;  %v129_v21 = vld [vmem:[#allocation4 + $0x68] sm:$0xff]  ;;  %v1616_v24 = vld [vmem:[#allocation4 + $0xb0] sm:$0xff]  ;;  %vm106_vm5 = vcmask 785408   ;;  %vm109_vm6 = vcmask 916480  }
  0x2b   :  { %51 = vrot.lane.b32.xlu0 %v1594_v5, %s1534_s7  ;;  %1266 = vmatprep.subr.bf16.mxu0 %v1265_v7  ;;  %v1612_v22 = vld [vmem:[#allocation4 + $0xa0] sm:$0xff]  ;;  %v1614_v23 = vld [vmem:[#allocation4 + $0xa8] sm:$0xff]  ;;  %v1618_v25 = vld [vmem:[#allocation4 + $0xb8] sm:$0xff]  ;;  %v1285_v26 = vpack.c.bf16 %v129_v21, %v128_v20  ;;  %vm333_vm7 = vcmask 1043456   ;;  %vm326_vm8 = vcmask 818176   ;;  %vm802_vm15 = vcmask 64512  }
  0x2c   :  { %v130_v27 = vld [vmem:[#allocation4 + $0x70] sm:$0xff]  ;;  %v131_v28 = vld [vmem:[#allocation4 + $0x78] sm:$0xff]  ;;  %v1409_v29 = vpack.i.bf16 %v1614_v23, %v1612_v22  ;;  %v1414_v30 = vpack.i.bf16 %v1618_v25, %v1616_v24  ;;  %v1626_v31 = vld [vmem:[#allocation4 + $0xc0] sm:$0xff] }
  0x2d   :  { %v1628_v32 = vld [vmem:[#allocation4 + $0xc8] sm:$0xff]  ;;  %v1630_v33 = vld [vmem:[#allocation4 + $0xd0] sm:$0xff]  ;;  %v1632_v34 = vld [vmem:[#allocation4 + $0xd8] sm:$0xff]  ;;  %v1289_v35 = vpack.c.bf16 %v131_v28, %v130_v27 }
  0x2e   :  { %63 = vrot.lane.b32.xlu1 %v1594_v5, %s1535_s1  ;;  %1268 = vmatpush3.bf16.msra.mxu0 %v1265_v7  ;;  %v1419_v36 = vpack.i.bf16 %v1628_v32, %v1626_v31  ;;  %v1424_v37 = vpack.i.bf16 %v1632_v34, %v1630_v33  ;;  %v1640_v38 = vld [vmem:[#allocation4 + $0xe0] sm:$0xff]  ;;  %v1642_v39 = vld [vmem:[#allocation4 + $0xe8] sm:$0xff]  ;;  %v1644_v40 = vld [vmem:[#allocation4 + $0xf0] sm:$0xff] }
  0x2f   :  { %61 = vrot.lane.b32.xlu0 %v1588_v0, %s1535_s1  ;;  %1270 = vmatprep.subr.bf16.mxu0 %v1269_v10  ;;  %v1646_v41 = vld [vmem:[#allocation4 + $0xf8] sm:$0xff]  ;;  %v1429_v42 = vpack.i.bf16 %v1642_v39, %v1640_v38  ;;  %v1656_v44 = vld [vmem:[#allocation4 + $0x100] sm:$0xf]  ;;  %v112_v4 = vld [vmem:[#allocation4 + $0x90] sm:$0xff] }
  0x30   :  { %v1434_v43 = vpack.i.bf16 %v1646_v41, %v1644_v40  ;;  %v113_v3 = vld [vmem:[#allocation4 + $0x98] sm:$0xff] }
  0x32   :  { %69 = vrot.lane.b32.xlu1 %v1594_v5, %s1536_s8  ;;  %1272 = vmatpush3.bf16.msra.mxu0 %v1269_v10 }
  0x33   :  { %67 = vrot.lane.b32.xlu0 %v1588_v0, %s1536_s8  ;;  %1274 = vmatprep.subr.bf16.mxu0 %v1273_v13 }
  0x36   :  { %75 = vrot.lane.b32.xlu1 %v1594_v5, %s1537_s9  ;;  %1276 = vmatpush3.bf16.msra.mxu0 %v1273_v13 }
  0x37   :  { %73 = vrot.lane.b32.xlu0 %v1588_v0, %s1537_s9  ;;  %1278 = vmatprep.subr.bf16.mxu0 %v1277_v16 }
  0x3a   :  { %81 = vrot.lane.b32.xlu1 %v1594_v5, %s1538_s10  ;;  %1280 = vmatpush3.bf16.msra.mxu0 %v1277_v16 }
  0x3b   :  { %79 = vrot.lane.b32.xlu0 %v1588_v0, %s1538_s10  ;;  %1282 = vmatprep.subr.bf16.mxu0 %v1281_v19 }
  0x3e   :  { %87 = vrot.lane.b32.xlu1 %v1594_v5, %s1539_s11  ;;  %1284 = vmatpush3.bf16.msra.mxu0 %v1281_v19 }
  0x3f   :  { %85 = vrot.lane.b32.xlu0 %v1588_v0, %s1539_s11  ;;  %1286 = vmatprep.subr.bf16.mxu0 %v1285_v26 }
  0x42   :  { %1415 = vrot.lane.b32.xlu1 %v1414_v30, %s1538_s10  ;;  %1288 = vmatpush3.bf16.msra.mxu0 %v1285_v26 }
  0x43   :  { %1410 = vrot.lane.b32.xlu0 %v1409_v29, %s1538_s10  ;;  %1290 = vmatprep.subr.bf16.mxu0 %v1289_v35 }
  0x46   :  { %1425 = vrot.lane.b32.xlu1 %v1424_v37, %s1538_s10  ;;  %1292 = vmatpush3.bf16.msra.mxu0 %v1289_v35 }
  0x47   :  { %1420 = vrot.lane.b32.xlu0 %v1419_v36, %s1538_s10 }
  0x4a   :  { %1435 = vrot.lane.b32.xlu1 %v1434_v43, %s1538_s10 }
  0x4b   :  { %1430 = vrot.lane.b32.xlu0 %v1429_v42, %s1538_s10 }
  0x4e   :  { %1440 = vrot.lane.b32.xlu1 %v1409_v29, %s1536_s8 }
  0x4f   :  { %312 = vrot.lane.b32.xlu0 %v1656_v44, %s1538_s10 }
  0x52   :  { %1450 = vrot.lane.b32.xlu1 %v1419_v36, %s1536_s8 }
  0x53   :  { %1445 = vrot.lane.b32.xlu0 %v1414_v30, %s1536_s8 }
  0x56   :  { %1460 = vrot.lane.b32.xlu1 %v1429_v42, %s1536_s8 }
  0x57   :  { %1455 = vrot.lane.b32.xlu0 %v1424_v37, %s1536_s8 }
  0x5a   :  { %518 = vrot.lane.b32.xlu1 %v1656_v44, %s1536_s8 }
  0x5b   :  { %1465 = vrot.lane.b32.xlu0 %v1434_v43, %s1536_s8 }
  0x98   :  { %v56_v45 = vpop.permute.xlu1 %55 }
  0x99   :  { %v50_v46 = vpop.permute.xlu0 %49 }
  0x9a   :  { %v92_v55 = vsel %vm91_vm0, %v1588_v0, %v50_v46 }
  0x9b   :  { %v95_v58 = vsel %vm94_vm1, %v92_v55, %v56_v45  ;;  %v133_v55 = vld [vmem:[#allocation4 + $0x88] sm:$0xff] }
  0x9c   :  { %v58_v47 = vpop.permute.xlu1 %57 }
  0x9d   :  { %v52_v48 = vpop.permute.xlu0 %51 }
  0x9e   :  { %v93_v56 = vsel %vm91_vm0, %v1594_v5, %v52_v48 }
  0x9f   :  { %v96_v57 = vsel %vm94_vm1, %v93_v56, %v58_v47  ;;  %v132_v56 = vld [vmem:[#allocation4 + $0x80] sm:$0xff] }
  0xa0   :  { %v64_v49 = vpop.permute.xlu1 %63 }
  0xa1   :  { %v62_v50 = vpop.permute.xlu0 %61  ;;  %v99_v61 = vsel %vm97_vm2, %v96_v57, %v64_v49 }
  0xa2   :  { %v98_v62 = vsel %vm97_vm2, %v95_v58, %v62_v50 }
  0xa4   :  { %v70_v51 = vpop.permute.xlu1 %69 }
  0xa5   :  { %v68_v52 = vpop.permute.xlu0 %67  ;;  %v102_v63 = vsel %vm100_vm3, %v99_v61, %v70_v51  ;;  %v1317_v51 = vpack.c.bf16 %v1614_v23, %v1612_v22  ;;  %v1321_v22 = vpack.c.bf16 %v1618_v25, %v1616_v24 }
  0xa6   :  { %v101_v0 = vsel %vm100_vm3, %v98_v62, %v68_v52  ;;  %v209_v52 = vlaneseq }
  0xa8   :  { %v76_v53 = vpop.permute.xlu1 %75 }
  0xa9   :  { %v74_v54 = vpop.permute.xlu0 %73  ;;  %v105_v1 = vsel %vm103_vm4, %v102_v63, %v76_v53  ;;  %v1682_v53 = vshrl.u32 %v209_v52, 7  ;;  %v706_v52 = vld [vmem:[#allocation4 + $0x128] sm:$0xff] }
  0xaa   :  { %v104_v2 = vsel %vm103_vm4, %v101_v0, %v74_v54  ;;  %v1540_v0 = vmov 0.0  }
  0xab   :  { %v216_v54 = vand.u32 7, %v1682_v53  ;;  %vm250_vm10 = vcmp.lt.s32.totalorder %v1682_v53, 1  ;;  %vm257_vm11 = vcmp.lt.s32.totalorder %v1682_v53, 7 }
  0xac   :  { %v82_v59 = vpop.permute.xlu1 %81 }
  0xad   :  { %v80_v60 = vpop.permute.xlu0 %79  ;;  %v108_v5 = vsel %vm106_vm5, %v105_v1, %v82_v59  ;;  %vm236_vm9 = vcmp.ne.s32.totalorder %v216_v54, 0  ;;  %vm242_vm13 = vcmp.ne.s32.totalorder %v216_v54, 7  ;;  %v707_v54 = vld [vmem:[#allocation4 + $0x130] sm:$0xff] }
  0xae   :  { %v107_v6 = vsel %vm106_vm5, %v104_v2, %v80_v60  ;;  %v1691_v1 = vsel %vm236_vm9, 1.0, %v1540_v0 }
  0xb0   :  { %v88_v7 = vpop.permute.xlu1 %87 }
  0xb1   :  { %v86_v8 = vpop.permute.xlu0 %85  ;;  %v111_v9 = vsel %vm109_vm6, %v108_v5, %v88_v7  ;;  %v1325_v5 = vpack.c.bf16 %v1628_v32, %v1626_v31  ;;  %v211_v7 = vadd.s32 8, %v1682_v53  ;;  %v1337_v31 = vpack.c.bf16 %v1646_v41, %v1644_v40 }
  0xb2   :  { %v110_v10 = vsel %vm109_vm6, %v107_v6, %v86_v8  ;;  %v115_v11 = vmul.f32 %v113_v3, %v111_v9  ;;  %v1329_v6 = vpack.c.bf16 %v1632_v34, %v1630_v33  ;;  %v1333_v8 = vpack.c.bf16 %v1642_v39, %v1640_v38 }
  0xb3   :  { %v114_v12 = vmul.f32 %v112_v4, %v110_v10  ;;  %v223_v9 = vand.u32 7, %v211_v7  ;;  %v1721_v40 = vsel %vm242_vm13, 1.0, %v1540_v0 }
  0xb4   :  { %v1416_v14 = vpop.permute.xlu1 %1415 }
  0xb5   :  { %1135 = vmatprep.mubr.f32.mxu0 %v114_v12  ;;  %v1411_v13 = vpop.permute.xlu0 %1410  ;;  %v1418_v17 = vunpack.i.h.bf16 %v1416_v14  ;;  %v1417_v18 = vunpack.i.l.bf16 %v1416_v14  ;;  %vm237_vm12 = vcmp.ne.s32.totalorder %v223_v9, 0  ;;  %vm243_vm14 = vcmp.ne.s32.totalorder %v223_v9, 7 }
  0xb6   :  { %1136 = vmatmul.mubr.f32.vlgmr.msra.gmra.mrb[0].mxu0 %v115_v11  ;;  %v1413_v15 = vunpack.i.h.bf16 %v1411_v13  ;;  %v1412_v16 = vunpack.i.l.bf16 %v1411_v13  ;;  %v1716_v13 = vsel %vm237_vm12, 1.0, %v1540_v0 }
  0xb7   :  { %v1297_v19 = vpack.c.bf16 %v1418_v17, %v1417_v18 }
  0xb8   :  { %v1293_v20 = vpack.c.bf16 %v1413_v15, %v1412_v16  ;;  %v1426_v26 = vpop.permute.xlu1 %1425 }
  0xb9   :  { %v1421_v21 = vpop.permute.xlu0 %1420  ;;  %v1428_v30 = vunpack.i.h.bf16 %v1426_v26  ;;  %v1427_v35 = vunpack.i.l.bf16 %v1426_v26 }
  0xba   :  { %1294 = vmatprep.subr.bf16.mxu1 %v1293_v20  ;;  %v1423_v27 = vunpack.i.h.bf16 %v1421_v21  ;;  %v1422_v28 = vunpack.i.l.bf16 %v1421_v21 }
  0xbb   :  { %1296 = vmatpush3.bf16.msra.mxu1 %v1293_v20  ;;  %v1305_v37 = vpack.c.bf16 %v1428_v30, %v1427_v35 }
  0xbc   :  { %v1301_v29 = vpack.c.bf16 %v1423_v27, %v1422_v28  ;;  %1298 = vmatprep.subr.bf16.mxu1 %v1297_v19  ;;  %v1436_v45 = vpop.permute.xlu1 %1435 }
  0xbd   :  { %v1431_v36 = vpop.permute.xlu0 %1430  ;;  %v1438_v47 = vunpack.i.h.bf16 %v1436_v45  ;;  %v1437_v48 = vunpack.i.l.bf16 %v1436_v45 }
  0xbe   :  { %v1433_v42 = vunpack.i.h.bf16 %v1431_v36  ;;  %v1432_v43 = vunpack.i.l.bf16 %v1431_v36 }
  0xbf   :  { %1300 = vmatpush3.bf16.msra.mxu1 %v1297_v19  ;;  %v1313_v49 = vpack.c.bf16 %v1438_v47, %v1437_v48  ;;  %v703_v47 = vld [vmem:[#allocation4 + $0x110] sm:$0xff]  ;;  %v704_v48 = vld [vmem:[#allocation4 + $0x118] sm:$0xff] }
  0xc0   :  { %1302 = vmatprep.subr.bf16.mxu1 %v1301_v29  ;;  %v1309_v46 = vpack.c.bf16 %v1433_v42, %v1432_v43  ;;  %v1441_v32 = vpop.permute.xlu1 %1440  ;;  %v1730_v43 = vsel %vm243_vm14, 1.0, %v1540_v0 }
  0xc1   :  { %v313_v50 = vpop.permute.xlu0 %312  ;;  %v1443_v11 = vunpack.i.h.bf16 %v1441_v32  ;;  %v1442_v33 = vunpack.i.l.bf16 %v1441_v32 }
  0xc3   :  { %1304 = vmatpush3.bf16.msra.mxu1 %v1301_v29  ;;  %v1341_v39 = vpack.c.bf16 %v1443_v11, %v1442_v33 }
  0xc4   :  { %1306 = vmatprep.subr.bf16.mxu1 %v1305_v37  ;;  %v1451_v38 = vpop.permute.xlu1 %1450 }
  0xc5   :  { %v1446_v10 = vpop.permute.xlu0 %1445  ;;  %v1453_v15 = vunpack.i.h.bf16 %v1451_v38  ;;  %v1452_v16 = vunpack.i.l.bf16 %v1451_v38 }
  0xc6   :  { %v1448_v34 = vunpack.i.h.bf16 %v1446_v10  ;;  %v1447_v12 = vunpack.i.l.bf16 %v1446_v10 }
  0xc7   :  { %1308 = vmatpush3.bf16.msra.mxu1 %v1305_v37  ;;  %v1349_v19 = vpack.c.bf16 %v1453_v15, %v1452_v16 }
  0xc8   :  { %1310 = vmatprep.subr.bf16.mxu1 %v1309_v46  ;;  %v1345_v14 = vpack.c.bf16 %v1448_v34, %v1447_v12  ;;  %v1461_v26 = vpop.permute.xlu1 %1460 }
  0xc9   :  { %v1456_v18 = vpop.permute.xlu0 %1455  ;;  %v1463_v28 = vunpack.i.h.bf16 %v1461_v26  ;;  %v1462_v29 = vunpack.i.l.bf16 %v1461_v26  ;;  %v713_v26 = vld [vmem:[#allocation4 + $0x160] sm:$0xff] }
  0xca   :  { %v1458_v20 = vunpack.i.h.bf16 %v1456_v18  ;;  %v1457_v21 = vunpack.i.l.bf16 %v1456_v18 }
  0xcb   :  { %1312 = vmatpush3.bf16.msra.mxu1 %v1309_v46  ;;  %v1357_v30 = vpack.c.bf16 %v1463_v28, %v1462_v29  ;;  %v702_v46 = vld [vmem:[#allocation4 + $0x108] sm:$0xff]  ;;  %v1011_v29 = vld [vmem:[#allocation4 + $0x181] ss:$0 sm:$0xff] }
  0xcc   :  { %1314 = vmatprep.subr.bf16.mxu1 %v1313_v49  ;;  %v1353_v27 = vpack.c.bf16 %v1458_v20, %v1457_v21  ;;  %v519_v42 = vpop.permute.xlu1 %518  ;;  %v712_v21 = vld [vmem:[#allocation4 + $0x158] sm:$0xff] }
  0xcf   :  { %1316 = vmatpush3.bf16.msra.mxu1 %v1313_v49  ;;  %v1365_v49 = vpack.c.bf16 %v703_v47, %v702_v46 }
  0xd0   :  { %1162 = vmatprep.subr.msk.mxu1 %vm333_vm7, %v313_v50 }
  0xd1   :  { %1366 = vmatprep.subr.bf16.mxu0 %v1365_v49 }
  0xd2   :  { %1368 = vmatpush3.bf16.msra.mxu0 %v1365_v49 }
  0xd3   :  { %1163 = vmatpush3.msk.msra.mxu1 %vm333_vm7, %v313_v50  ;;  %v705_v50 = vld [vmem:[#allocation4 + $0x120] sm:$0xff] }
  0xd4   :  { %1318 = vmatprep.subr.bf16.mxu1 %v1317_v51 }
 0x189   :  { %v1137_v57 = vpop.f32.mrb[0].mxu0 }
 0x18a   :  { %v206_v58 = vadd.f32 %v1137_v57, %v133_v55  ;;  %v200_v59 = vpop.f32.mrb[1].mxu0  ;;  %v1373_v55 = vpack.c.bf16 %v707_v54, %v706_v52  ;;  %v709_v57 = vld [vmem:[#allocation4 + $0x140] sm:$0xff] }
 0x18b   :  { %v201_v60 = vadd.f32 %v200_v59, %v132_v56  ;;  %v708_v56 = vld [vmem:[#allocation4 + $0x138] sm:$0xff]  ;;  %v710_v59 = vld [vmem:[#allocation4 + $0x148] sm:$0xff] }
 0x18c   :  { %v249_v61 = vrot.slane %v206_v58, 7  ;;  %v256_v62 = vrot.slane %v206_v58, 1 }
 0x18d   :  { %v248_v23 = vrot.slane %v201_v60, 7  ;;  %v255_v63 = vrot.slane %v201_v60, 1  ;;  %1164 = vmatprep.mubr.msk.f32.mxu1 %vm326_vm8, %v201_v60  ;;  %v711_v60 = vld [vmem:[#allocation4 + $0x150] sm:$0xff] }
 0x18e   :  { %1165 = vmatmul.mubr.msk.f32.vlgmr.msra.gmra.mrb[0].mxu1 %vm326_vm8, %v206_v58  ;;  %v1377_v58 = vpack.c.bf16 %v709_v57, %v708_v56 }
 0x18f   :  { %v251_v2 = vsel %vm250_vm10, %v248_v23, %v249_v61  ;;  %v1698_v3 = vsel %vm257_vm11, %v256_v62, %v255_v63  ;;  %1320 = vmatpush3.bf16.msra.mxu1 %v1317_v51  ;;  %v252_v24 = vsel %vm250_vm10, %v249_v61, %v248_v23  ;;  %v258_v25 = vsel %vm257_vm11, %v255_v63, %v256_v62  ;;  %v1010_v62 = vld [vmem:[#allocation4 + $0x180] ss:$0 sm:$0xff] }
 0x190   :  { %1322 = vmatprep.subr.bf16.mxu1 %v1321_v22  ;;  %v253_v4 = vmul.f32 %v1691_v1, %v252_v24  ;;  %v254_v41 = vmul.f32 %v1716_v13, %v251_v2  ;;  %v260_v17 = vmul.f32 %v1721_v40, %v258_v25  ;;  %v261_v45 = vmul.f32 %v1730_v43, %v1698_v3 }
 0x191   :  { %v1369_v51 = vpack.c.bf16 %v705_v50, %v704_v48  ;;  %v1381_v61 = vpack.c.bf16 %v711_v60, %v710_v59 }
 0x192   :  { %1193 = vmatprep.mubr.msk.f32.mxu1 %vm326_vm8, %v253_v4 }
 0x193   :  { %1324 = vmatpush3.bf16.msra.mxu1 %v1321_v22  ;;  %1370 = vmatprep.subr.bf16.mxu0 %v1369_v51 }
 0x194   :  { %1326 = vmatprep.subr.bf16.mxu1 %v1325_v5  ;;  %1372 = vmatpush3.bf16.msra.mxu0 %v1369_v51 }
 0x195   :  { %1374 = vmatprep.subr.bf16.mxu0 %v1373_v55 }
 0x197   :  { %1328 = vmatpush3.bf16.msra.mxu1 %v1325_v5 }
 0x198   :  { %1330 = vmatprep.subr.bf16.mxu1 %v1329_v6  ;;  %1376 = vmatpush3.bf16.msra.mxu0 %v1373_v55 }
 0x199   :  { %1378 = vmatprep.subr.bf16.mxu0 %v1377_v58 }
 0x19b   :  { %1332 = vmatpush3.bf16.msra.mxu1 %v1329_v6 }
 0x19c   :  { %1334 = vmatprep.subr.bf16.mxu1 %v1333_v8  ;;  %1380 = vmatpush3.bf16.msra.mxu0 %v1377_v58 }
 0x19d   :  { %1382 = vmatprep.subr.bf16.mxu0 %v1381_v61 }
 0x19f   :  { %1336 = vmatpush3.bf16.msra.mxu1 %v1333_v8 }
 0x1a0   :  { %1338 = vmatprep.subr.bf16.mxu1 %v1337_v31  ;;  %1384 = vmatpush3.bf16.msra.mxu0 %v1381_v61 }
 0x1a3   :  { %1340 = vmatpush3.bf16.msra.mxu1 %v1337_v31 }
 0x1a4   :  { %1191 = vmatprep.subr.msk.mxu1 %vm333_vm7, %v1656_v44 }
 0x1a7   :  { %1192 = vmatpush3.msk.msra.mxu1 %vm333_vm7, %v1656_v44  ;;  %v1466_v44 = vpop.permute.xlu0 %1465 }
 0x1a8   :  { %1194 = vmatmul.mubr.msk.f32.vlgmr.msra.gmra.mrb[0].mxu1 %vm326_vm8, %v254_v41  ;;  %1342 = vmatprep.subr.bf16.mxu1 %v1341_v39  ;;  %v1468_v35 = vunpack.i.h.bf16 %v1466_v44  ;;  %v1467_v36 = vunpack.i.l.bf16 %v1466_v44 }
 0x1a9   :  { %1344 = vmatpush3.bf16.msra.mxu1 %v1341_v39  ;;  %1222 = vmatprep.mubr.msk.f32.mxu1 %vm326_vm8, %v260_v17 }
 0x1aa   :  { %1346 = vmatprep.subr.bf16.mxu1 %v1345_v14  ;;  %v1361_v37 = vpack.c.bf16 %v1468_v35, %v1467_v36  ;;  %v1012_v35 = vld [vmem:[#allocation4 + $0x182] ss:$0 sm:$0xff] }
 0x1ad   :  { %1348 = vmatpush3.bf16.msra.mxu1 %v1345_v14 }
 0x1ae   :  { %1350 = vmatprep.subr.bf16.mxu1 %v1349_v19 }
 0x1b1   :  { %1352 = vmatpush3.bf16.msra.mxu1 %v1349_v19 }
 0x1b2   :  { %1354 = vmatprep.subr.bf16.mxu1 %v1353_v27 }
 0x1b5   :  { %1356 = vmatpush3.bf16.msra.mxu1 %v1353_v27  ;;  %v1385_v27 = vpack.c.bf16 %v713_v26, %v712_v21 }
 0x1b6   :  { %1358 = vmatprep.subr.bf16.mxu1 %v1357_v30 }
 0x1b7   :  { %1386 = vmatprep.subr.bf16.mxu0 %v1385_v27 }
 0x1b8   :  { %1388 = vmatpush3.bf16.msra.mxu0 %v1385_v27 }
 0x1b9   :  { %1360 = vmatpush3.bf16.msra.mxu1 %v1357_v30 }
 0x1ba   :  { %1362 = vmatprep.subr.bf16.mxu1 %v1361_v37 }
 0x1bd   :  { %1364 = vmatpush3.bf16.msra.mxu1 %v1361_v37 }
 0x1be   :  { %1220 = vmatprep.subr.msk.mxu1 %vm333_vm7, %v519_v42 }
 0x1c1   :  { %1221 = vmatpush3.msk.msra.mxu1 %vm333_vm7, %v519_v42 }
 0x1c2   :  { %1223 = vmatmul.mubr.msk.f32.vlgmr.msra.gmra.mrb[0].mxu1 %vm326_vm8, %v261_v45 }
 0x295   :  { %v1224_v22 = vpop.f32.mrb[0].mxu1 }
 0x296   :  { %v623_v23 = vadd.f32 %v1224_v22, %v1010_v62  ;;  %v606_v63 = vpop.f32.mrb[1].mxu1 }
 0x297   :  { %v622_v0 = vadd.f32 %v1010_v62, %v606_v63 }
 0x298   :  { %v627_v2 = vsel %vm94_vm1, %v623_v23, 0.0  ;;  %v636_v3 = vmul.f32 %v623_v23, %v623_v23 }
 0x299   :  { %v626_v24 = vsel %vm94_vm1, %v622_v0, 0.0  ;;  %v635_v25 = vmul.f32 %v622_v0, %v622_v0 }
 0x29a   :  { %v638_v4 = vsel %vm94_vm1, %v636_v3, 0.0  ;;  %v628_v5 = vadd.f32 %v627_v2, %v626_v24  ;;  %v1013_v24 = vld [vmem:[#allocation4 + $0x183] ss:$0 sm:$0xff] }
 0x29b   :  { %v637_v6 = vsel %vm94_vm1, %v635_v25, 0.0 }
 0x29c   :  { %v629_v7 = vrot.slane %v628_v5, 4  ;;  %v639_v8 = vadd.f32 %v638_v4, %v637_v6 }
 0x29e   :  { %v630_v9 = vadd.f32 %v629_v7, %v628_v5  ;;  %v640_v31 = vrot.slane %v639_v8, 4 }
 0x2a0   :  { %v631_v32 = vrot.slane %v630_v9, 2  ;;  %v641_v10 = vadd.f32 %v640_v31, %v639_v8 }
 0x2a2   :  { %v632_v11 = vadd.f32 %v631_v32, %v630_v9  ;;  %v642_v33 = vrot.slane %v641_v10, 2 }
 0x2a4   :  { %v633_v34 = vrot.slane %v632_v11, 1  ;;  %v643_v12 = vadd.f32 %v642_v33, %v641_v10 }
 0x2a6   :  { %v634_v38 = vadd.f32 %v633_v34, %v632_v11  ;;  %v644_v39 = vrot.slane %v643_v12, 1 }
 0x2a8   :  { %v645_v41 = vadd.f32 %v644_v39, %v643_v12  ;;  %v646_v14 = vmul.f32 0.0625, %v634_v38 }
 0x2aa   :  { %v647_v15 = vmul.f32 0.0625, %v645_v41  ;;  %v648_v16 = vmul.f32 %v646_v14, %v646_v14  ;;  %v650_v17 = vsub.f32 %v622_v0, %v646_v14  ;;  %v651_v18 = vsub.f32 %v623_v23, %v646_v14 }
 0x2ac   :  { %v649_v19 = vsub.f32 %v647_v15, %v648_v16 }
 0x2ae   :  { %v652_v20 = vadd.f32 1e-05, %v649_v19 }
 0x2b0   :  { %1469 = vrsqrt.f32 %v652_v20 }
 0x2ba   :  { %v1470_v28 = vpop.eup %1469 }
 0x2bb   :  { %v654_v44 = vmul.f32 %v1470_v28, %v650_v17  ;;  %v655_v30 = vmul.f32 %v1470_v28, %v651_v18 }
 0x2bd   :  { %v661_v36 = vmul.f32 %v1011_v29, %v655_v30  ;;  %v660_v37 = vmul.f32 %v1011_v29, %v654_v44 }
 0x2bf   :  { %v667_v42 = vadd.f32 %v1012_v35, %v661_v36  ;;  %v666_v45 = vadd.f32 %v1012_v35, %v660_v37  ;;  %v879_v35 = vld [vmem:[#allocation4 + $0x168] sm:$0xff]  ;;  %v880_v36 = vld [vmem:[#allocation4 + $0x170] sm:$0xff] }
 0x2c0   :  { %v1389_v37 = vpack.c.bf16 %v880_v36, %v879_v35 }
 0x2c1   :  { %v669_v46 = vmax.f32 %v667_v42, 0.0  ;;  %v668_v47 = vmax.f32 %v666_v45, 0.0  ;;  %v881_v42 = vld [vmem:[#allocation4 + $0x178] sm:$0xff] }
 0x2c2   :  { %1390 = vmatprep.subr.bf16.mxu0 %v1389_v37 }
 0x2c3   :  { %686 = vrot.lane.b32.xlu1 %v669_v46, %s1533_s6  ;;  %v671_v48 = vrot.slane %v669_v46, 7  ;;  %v677_v49 = vrot.slane %v669_v46, 1  ;;  %684 = vrot.lane.b32.xlu0 %v668_v47, %s1533_s6  ;;  %v670_v50 = vrot.slane %v668_v47, 7  ;;  %v676_v51 = vrot.slane %v668_v47, 1  ;;  %v1016_v46 = vld [vmem:[#allocation4 + $0x184] ss:$0 sm:$0xff] }
 0x2c5   :  { %v679_v52 = vsel %vm257_vm11, %v677_v49, %v676_v51  ;;  %v678_v54 = vsel %vm257_vm11, %v676_v51, %v677_v49  ;;  %v672_v55 = vsel %vm250_vm10, %v670_v50, %v671_v48  ;;  %v673_v56 = vsel %vm250_vm10, %v671_v48, %v670_v50  ;;  %v1017_v49 = vld [vmem:[#allocation4 + $0x185] ss:$0 sm:$0xff] }
 0x2c6   :  { %v681_v57 = vmul.f32 %v1730_v43, %v679_v52  ;;  %v680_v58 = vmul.f32 %v1721_v40, %v678_v54  ;;  %v675_v61 = vmul.f32 %v1716_v13, %v672_v55  ;;  %v674_v62 = vmul.f32 %v1691_v1, %v673_v56 }
 0x2c8   :  { %694 = vrot.lane.b32.xlu1 %v681_v57, %s1536_s8  ;;  %692 = vrot.lane.b32.xlu0 %v680_v58, %s1536_s8 }
 0x335   :  { %v687_v59 = vpop.permute.xlu1 %686  ;;  %v685_v60 = vpop.permute.xlu0 %684 }
 0x336   :  { %v699_v22 = vsel %vm94_vm1, %v675_v61, %v687_v59  ;;  %v698_v23 = vsel %vm94_vm1, %v674_v62, %v685_v60  ;;  %vm887_vm1 = vcmask 195584  }
 0x33a   :  { %v695_v63 = vpop.permute.xlu1 %694  ;;  %v693_v0 = vpop.permute.xlu0 %692 }
 0x33b   :  { %v701_v2 = vsel %vm100_vm3, %v699_v22, %v695_v63  ;;  %v700_v3 = vsel %vm100_vm3, %v698_v23, %v693_v0 }
 0x33c   :  { %1249 = vmatprep.mubr.msk.f32.mxu0 %vm106_vm5, %v700_v3 }
 0x33d   :  { %1250 = vmatmul.mubr.msk.f32.vlgmr.msra.gmra.mrb[2].mxu0 %vm106_vm5, %v701_v2 }
 0x33e   :  { %1392 = vmatpush3.bf16.msra.mxu0 %v1389_v37 }
 0x33f   :  { %1256 = vmatprep.subr.mxu0 %v881_v42 }
 0x342   :  { %1257 = vmatpush3.msra.mxu0 %v881_v42 }
 0x410   :  { %v1251_v25 = vpop.f32.mrb[2].mxu0 }
 0x411   :  { %v797_v4 = vadd.f32 %v1251_v25, %v1013_v24  ;;  %v791_v5 = vpop.f32.mrb[3].mxu0 }
 0x412   :  { %v792_v6 = vadd.f32 %v1013_v24, %v791_v5 }
 0x413   :  { %v804_v7 = vsel %vm802_vm15, %v797_v4, 0.0  ;;  %v813_v8 = vmul.f32 %v797_v4, %v797_v4 }
 0x414   :  { %v803_v9 = vsel %vm802_vm15, %v792_v6, 0.0  ;;  %v812_v31 = vmul.f32 %v792_v6, %v792_v6 }
 0x415   :  { %v815_v32 = vsel %vm802_vm15, %v813_v8, 0.0  ;;  %v805_v10 = vadd.f32 %v804_v7, %v803_v9  ;;  %v1018_v7 = vld [vmem:[#allocation4 + $0x186] ss:$0 sm:$0xff] }
 0x416   :  { %v814_v11 = vsel %vm802_vm15, %v812_v31, 0.0 }
 0x417   :  { %v806_v33 = vrot.slane %v805_v10, 4  ;;  %v816_v34 = vadd.f32 %v815_v32, %v814_v11 }
 0x419   :  { %v807_v12 = vadd.f32 %v806_v33, %v805_v10  ;;  %v817_v38 = vrot.slane %v816_v34, 4 }
 0x41b   :  { %v808_v39 = vrot.slane %v807_v12, 2  ;;  %v818_v41 = vadd.f32 %v817_v38, %v816_v34 }
 0x41d   :  { %v809_v14 = vadd.f32 %v808_v39, %v807_v12  ;;  %v819_v15 = vrot.slane %v818_v41, 2 }
 0x41f   :  { %v810_v16 = vrot.slane %v809_v14, 1  ;;  %v820_v17 = vadd.f32 %v819_v15, %v818_v41 }
 0x421   :  { %v811_v18 = vadd.f32 %v810_v16, %v809_v14  ;;  %v821_v19 = vrot.slane %v820_v17, 1 }
 0x423   :  { %v822_v20 = vadd.f32 %v821_v19, %v820_v17  ;;  %v823_v21 = vmul.f32 0.0625, %v811_v18 }
 0x425   :  { %v824_v26 = vmul.f32 0.0625, %v822_v20  ;;  %v825_v27 = vmul.f32 %v823_v21, %v823_v21  ;;  %v827_v28 = vsub.f32 %v792_v6, %v823_v21  ;;  %v828_v29 = vsub.f32 %v797_v4, %v823_v21 }
 0x427   :  { %v826_v44 = vsub.f32 %v824_v26, %v825_v27 }
 0x429   :  { %v829_v30 = vadd.f32 1e-05, %v826_v44 }
 0x42b   :  { %1471 = vrsqrt.f32 %v829_v30 }
 0x435   :  { %v1472_v45 = vpop.eup %1471 }
 0x436   :  { %v831_v47 = vmul.f32 %v1472_v45, %v827_v28  ;;  %v832_v48 = vmul.f32 %v1472_v45, %v828_v29 }
 0x438   :  { %v838_v50 = vmul.f32 %v1016_v46, %v832_v48  ;;  %v837_v51 = vmul.f32 %v1016_v46, %v831_v47 }
 0x43a   :  { %v844_v52 = vadd.f32 %v1017_v49, %v838_v50  ;;  %v843_v54 = vadd.f32 %v1017_v49, %v837_v51 }
 0x43c   :  { %v846_v55 = vmax.f32 %v844_v52, 0.0  ;;  %v845_v56 = vmax.f32 %v843_v54, 0.0 }
 0x43e   :  { %863 = vrot.lane.b32.xlu1 %v846_v55, %s1532_s3  ;;  %v848_v57 = vrot.slane %v846_v55, 7  ;;  %v854_v58 = vrot.slane %v846_v55, 1  ;;  %861 = vrot.lane.b32.xlu0 %v845_v56, %s1532_s3  ;;  %v847_v59 = vrot.slane %v845_v56, 7  ;;  %v853_v60 = vrot.slane %v845_v56, 1 }
 0x440   :  { %v856_v61 = vsel %vm257_vm11, %v854_v58, %v853_v60  ;;  %v855_v62 = vsel %vm257_vm11, %v853_v60, %v854_v58  ;;  %v849_v22 = vsel %vm250_vm10, %v847_v59, %v848_v57  ;;  %v850_v23 = vsel %vm250_vm10, %v848_v57, %v847_v59 }
 0x441   :  { %v858_v63 = vmul.f32 %v1730_v43, %v856_v61  ;;  %v857_v0 = vmul.f32 %v1721_v40, %v855_v62  ;;  %v852_v24 = vmul.f32 %v1716_v13, %v849_v22  ;;  %v851_v25 = vmul.f32 %v1691_v1, %v850_v23 }
 0x443   :  { %871 = vrot.lane.b32.xlu1 %v858_v63, %s1534_s7  ;;  %869 = vrot.lane.b32.xlu0 %v857_v0, %s1534_s7 }
 0x4b0   :  { %v864_v2 = vpop.permute.xlu1 %863  ;;  %v862_v3 = vpop.permute.xlu0 %861 }
 0x4b1   :  { %v876_v4 = vsel %vm802_vm15, %v852_v24, %v864_v2  ;;  %v875_v53 = vsel %vm802_vm15, %v851_v25, %v862_v3 }
 0x4b5   :  { %v872_v5 = vpop.permute.xlu1 %871  ;;  %v870_v6 = vpop.permute.xlu0 %869 }
 0x4b6   :  { %v878_v43 = vsel %vm91_vm0, %v876_v4, %v872_v5  ;;  %v877_v40 = vsel %vm91_vm0, %v875_v53, %v870_v6 }
 0x4b7   :  { %1258 = vmatprep.mubr.msk.f32.mxu0 %vm887_vm1, %v877_v40 }
 0x4b8   :  { %1259 = vmatmul.mubr.msk.f32.vlgmr.msra.gmra.mrb[4].mxu0 %vm887_vm1, %v878_v43 }
 0x58b   :  { %v1260_v8 = vpop.f32.mrb[4].mxu0 }
 0x58c   :  { %v966_v9 = vadd.f32 %v1260_v8, %v1018_v7  ;;  %v960_v31 = vpop.f32.mrb[5].mxu0 }
 0x58d   :  { %v961_v13 = vadd.f32 %v1018_v7, %v960_v31 }
 0x58e   :  { %971 = vmax.xlane.f32.xlu1 %v966_v9 }
 0x58f   :  { %969 = vmax.xlane.f32.xlu0 %v961_v13 }
 0x61b   :  { %v972_v1 = vpop.xlane.xlu1 %971 }
 0x61c   :  { %v970_v32 = vpop.xlane.xlu0 %969  ;;  %v974_v10 = vsub.f32 %v966_v9, %v972_v1 }
 0x61d   :  { %v973_v11 = vsub.f32 %v961_v13, %v970_v32 }
 0x61e   :  { %v977_v34 = vmul.f32 1.442695, %v974_v10 }
 0x61f   :  { %v975_v33 = vmul.f32 1.442695, %v973_v11 }
 0x621   :  { %1473 = vpow2.f32 %v975_v33 }
 0x622   :  { %1475 = vpow2.f32 %v977_v34 }
 0x62b   :  { %v1474_v12 = vpop.eup %1473 }
 0x62c   :  { %979 = vadd.xlane.f32.xlu0 %v1474_v12  ;;  %v1476_v38 = vpop.eup %1475 }
 0x630   :  { %981 = vadd.xlane.f32.xlu0 %v1476_v38 }
 0x6b9   :  { %v980_v39 = vpop.xlane.xlu0 %979 }
 0x6ba   :  { %1477 = vrcp.f32 %v980_v39 }
 0x6bd   :  { %v982_v41 = vpop.xlane.xlu0 %981 }
 0x6be   :  { %1479 = vrcp.f32 %v982_v41 }
 0x6c4   :  { %v1478_v14 = vpop.eup %1477 }
 0x6c5   :  { %v985_v15 = vmul.f32 %v1478_v14, %v1474_v12 }
 0x6c7   :  { %987 = vst [vmem:[%s1795_s2] sm:$0xff] %v985_v15 }
 0x6c8   :  { %v1480_v16 = vpop.eup %1479 }
 0x6c9   :  { %v986_v17 = vmul.f32 %v1480_v16, %v1476_v38 }
 0x6cb   :  { %988 = vst [vmem:[%s1795_s2 + $0x8] sm:$0xff] %v986_v17 }
 0x6cc   :  { %993 = vsyncpa [#allocation3], 1 }
 0x6cd   :  { %994 = vsyncpa [#allocation5], 1 }

</bundles_post_ra>
